<compile_context>
chip_gen: v7x
topology: tpu7x:2x2x1
jax: 0.10.0
libtpu: 0.0.40
codegen_flags: <defaults>
</compile_context>

<pallas_src>
import functools

import jax
import jax.numpy as jnp
from jax.experimental import pallas as pl
from jax.experimental.pallas import tpu as pltpu


# ----------------------------------------------------------------------------
# Kernels
# ----------------------------------------------------------------------------
def _expert_kernel_resident(x_ref, w1_ref, b1_ref, w2_ref, b2_ref, o_ref):
    """Whole expert for one token tile; full w1/w2 resident in VMEM."""
    h = jnp.dot(x_ref[...], w1_ref[...], preferred_element_type=jnp.float32)
    h = jnp.maximum(h + b1_ref[...], 0.0)
    y = jnp.dot(h.astype(w2_ref.dtype), w2_ref[...],
                preferred_element_type=jnp.float32)
    o_ref[...] = (y + b2_ref[...]).astype(o_ref.dtype)


def _expert_kernel_tiled(x_ref, w1_ref, b1_ref, w2_ref, b2_ref, o_ref):
    """grid = (token tiles, d_out tiles, hidden tiles [reduction, innermost]).

    Partial fc2 products are accumulated directly into the f32 output block,
    which is invariant along the reduction axis (no VMEM scratch needed).
    """
    k = pl.program_id(2)

    # fc1 for this hidden tile: (tm, D_in) @ (D_in, th) -> f32 on the MXU.
    h = jnp.dot(x_ref[...], w1_ref[...], preferred_element_type=jnp.float32)
    # Bias + ReLU in f32 on the VPU (b1 block is (1, th), broadcasts over rows).
    h = jnp.maximum(h + b1_ref[...], 0.0)
    # fc2 partial product for this hidden tile.
    partial = jnp.dot(h.astype(w2_ref.dtype), w2_ref[...],
                      preferred_element_type=jnp.float32)

    @pl.when(k == 0)
    def _init():
        # First reduction step also adds the output bias (exactly once).
        o_ref[...] = partial + b2_ref[...]

    @pl.when(k != 0)
    def _acc():
        o_ref[...] += partial


# ----------------------------------------------------------------------------
# Planning helpers (tile / path selection sized to this chip's VMEM)
# ----------------------------------------------------------------------------
_TM_CANDIDATES = (1024, 768, 512, 384, 256, 128)   # token tile
_TH_CANDIDATES = (512, 256, 128)                    # hidden tile
_TN_CANDIDATES = (2048, 1024, 512, 256, 128)        # d_out tile


def _vmem_capacity_bytes():
    try:
        info = pltpu.get_tpu_info()
        cap = getattr(info, "vmem_capacity_bytes", None)
        if cap:
            return int(cap)
    except Exception:
        pass
    # Conservative fallback = smallest generation (v7x: 64 MiB per TensorCore).
    return 64 * 1024 * 1024


def _largest_tile(dim, candidates):
    for c in candidates:
        if c <= dim and dim % c == 0:
            return c
    return dim  # fall back to the full (untiled) dimension


def _shrink(dim, cur, candidates):
    smaller = [c for c in candidates if c < cur and dim % c == 0]
    return smaller[0] if smaller else cur


def _plan(B, D_in, H, D_out, mode):
    cap = _vmem_capacity_bytes()
    budget = int(cap * 0.70)                               # double-buffered target
    vmem_limit = min(int(cap * 0.85), 100 * 1024 * 1024)   # scoped VMEM ceiling

    tm = _largest_tile(B, _TM_CANDIDATES)

    # --- Resident-weights path: bf16 w1/w2 held fully in VMEM. ---------------
    def resident_fp(tm_):
        return (2 * tm_ * D_in * 2            # x tile, double-buffered, bf16
                + 2 * D_in * H * 2            # w1 (conservatively 2 buffers)
                + 2 * H * D_out * 2           # w2
                + 2 * tm_ * D_out * 4         # output tile, f32
                + 2 * (H + D_out) * 4)        # biases, f32

    if mode in ("auto", "resident"):
        tm_r = tm
        while resident_fp(tm_r) > budget and tm_r > 128:
            smaller = [c for c in _TM_CANDIDATES if c < tm_r and B % c == 0]
            if not smaller:
                break
            tm_r = smaller[0]
        if resident_fp(tm_r) <= budget or mode == "resident":
            return dict(path="resident", tm=tm_r, th=H, tn=D_out,
                        vmem_limit=vmem_limit)

    # --- Tiled path: 3-D grid, shrink tiles until the working set fits. ------
    th = _largest_tile(H, _TH_CANDIDATES)
    tn = _largest_tile(D_out, _TN_CANDIDATES)

    def tiled_fp(tm_, th_, tn_):
        return (2 * tm_ * D_in * 2 + 2 * D_in * th_ * 2 + 2 * th_ * tn_ * 2
                + 2 * tm_ * tn_ * 4 + 2 * (th_ + tn_) * 4)

    while tiled_fp(tm, th, tn) > budget:
        new_tn = _shrink(D_out, tn, _TN_CANDIDATES)
        new_tm = _shrink(B, tm, _TM_CANDIDATES)
        new_th = _shrink(H, th, _TH_CANDIDATES)
        if new_tn != tn and tn > 512:
            tn = new_tn
        elif new_tm != tm and tm > 256:
            tm = new_tm
        elif new_th != th and th > 128:
            th = new_th
        elif new_tn != tn:
            tn = new_tn
        elif new_tm != tm:
            tm = new_tm
        else:
            break
    return dict(path="tiled", tm=tm, th=th, tn=tn, vmem_limit=vmem_limit)


# ----------------------------------------------------------------------------
# pallas_call wrapper
# ----------------------------------------------------------------------------
@functools.partial(jax.jit,
                   static_argnames=("path", "tm", "th", "tn", "vmem_limit"))
def _expert_call(x, w1, b1, w2, b2, *, path, tm, th, tn, vmem_limit):
    B, D_in = x.shape
    H = w1.shape[1]
    D_out = w2.shape[1]

    # No-ops if the caller already keeps x/w1/w2 in bf16 (recommended for weights).
    x = x.astype(jnp.bfloat16)
    w1 = w1.astype(jnp.bfloat16)
    w2 = w2.astype(jnp.bfloat16)
    b1 = b1.reshape(1, H).astype(jnp.float32)
    b2 = b2.reshape(1, D_out).astype(jnp.float32)

    out_shape = jax.ShapeDtypeStruct((B, D_out), jnp.float32)
    flops = 2 * B * (D_in * H + H * D_out)

    if path == "resident":
        grid = (B // tm,)
        grid_spec = pl.GridSpec(
            grid=grid,
            in_specs=[
                pl.BlockSpec((tm, D_in), lambda i: (i, 0)),
                # Constant index_maps -> weights/biases DMA'd from HBM once.
                pl.BlockSpec((D_in, H), lambda i: (0, 0)),
                pl.BlockSpec((1, H), lambda i: (0, 0)),
                pl.BlockSpec((H, D_out), lambda i: (0, 0)),
                pl.BlockSpec((1, D_out), lambda i: (0, 0)),
            ],
            out_specs=pl.BlockSpec((tm, D_out), lambda i: (i, 0)),
        )
        kernel = _expert_kernel_resident
        dims = ("parallel",)
        bytes_accessed = (x.size * 2 + w1.size * 2 + w2.size * 2
                          + (b1.size + b2.size) * 4 + B * D_out * 4)
    else:
        assert B % tm == 0 and H % th == 0 and D_out % tn == 0, (
            "tiled path requires tile sizes to divide (B, H, D_out)")
        grid = (B // tm, D_out // tn, H // th)
        grid_spec = pl.GridSpec(
            grid=grid,
            in_specs=[
                # x tile: invariant along j and the inner reduction axis k.
                pl.BlockSpec((tm, D_in), lambda i, j, k: (i, 0)),
                # w1 / b1 stream along the hidden reduction axis.
                # TODO(synk): add pipeline_mode=pl.Buffered(3) here only if
                # profiling still shows exposed weight DMA at these tile sizes.
                pl.BlockSpec((D_in, th), lambda i, j, k: (0, k)),
                pl.BlockSpec((1, th), lambda i, j, k: (0, k)),
                # w2 / b2 tiled over (hidden, d_out) / (d_out).
                pl.BlockSpec((th, tn), lambda i, j, k: (k, j)),
                pl.BlockSpec((1, tn), lambda i, j, k: (0, j)),
            ],
            # Output block invariant along k -> stays VMEM-resident and acts as
            # the f32 accumulator (no scratch needed).
            out_specs=pl.BlockSpec((tm, tn), lambda i, j, k: (i, j)),
        )
        kernel = _expert_kernel_tiled
        dims = ("parallel", "parallel", "arbitrary")
        n_i, n_j = grid[0], grid[1]
        # Weight re-streaming accounted for: w1 fetched per (i, j), w2 per i.
        bytes_accessed = (x.size * 2 + B * D_out * 4
                          + n_i * n_j * w1.size * 2 + n_i * w2.size * 2
                          + n_i * n_j * (b1.size + b2.size) * 4)

    return pl.pallas_call(
        kernel,
        out_shape=out_shape,
        grid_spec=grid_spec,
        compiler_params=pltpu.CompilerParams(
            dimension_semantics=dims,
            vmem_limit_bytes=int(vmem_limit),
        ),
        cost_estimate=pl.CostEstimate(
            flops=int(flops), transcendentals=0,
            bytes_accessed=int(bytes_accessed)),
    )(x, w1, b1, w2, b2)


def expert_forward(x, w1, b1, w2, b2, *, mode="auto", tiles=None):
    """y = relu(x @ w1 + b1) @ w2 + b2.

    mode: "auto" (pick resident vs tiled from the VMEM budget), "resident",
          or "tiled".  tiles=(tm, th, tn) forces the tiled path with those tiles.
    """
    B, D_in = x.shape
    H = w1.shape[1]
    D_out = w2.shape[1]
    if tiles is not None:
        tm, th, tn = tiles
        plan = dict(path="tiled", tm=tm, th=th, tn=tn,
                    vmem_limit=min(int(_vmem_capacity_bytes() * 0.85),
                                   100 * 1024 * 1024))
    else:
        plan = _plan(B, D_in, H, D_out, mode)
    return _expert_call(x, w1, b1, w2, b2, path=plan["path"], tm=plan["tm"],
                        th=plan["th"], tn=plan["tn"],
                        vmem_limit=plan["vmem_limit"])


# ----------------------------------------------------------------------------
# Self-test
# ----------------------------------------------------------------------------
if __name__ == "__main__":
    # Small but lane-dense shapes (multiples of 128 on matmul-facing dims).
    B, D_IN, HIDDEN, D_OUT = 256, 128, 256, 256

    key = jax.random.PRNGKey(0)
    kx, k1, kb1, k2, kb2 = jax.random.split(key, 5)

    x = jax.random.normal(kx, (B, D_IN), dtype=jnp.float32)
    # Deterministic synthetic parameters (not a checkpoint load).
    w1 = jax.random.normal(k1, (D_IN, HIDDEN), dtype=jnp.float32) * 0.1
    b1 = jax.random.normal(kb1, (HIDDEN,), dtype=jnp.float32) * 0.1
    w2 = jax.random.normal(k2, (HIDDEN, D_OUT), dtype=jnp.float32) * 0.1
    b2 = jax.random.normal(kb2, (D_OUT,), dtype=jnp.float32) * 0.1

    # Keep weights persistently in bf16 (no per-call re-cast on the hot path).
    w1_bf = w1.astype(jnp.bfloat16)
    w2_bf = w2.astype(jnp.bfloat16)

    # Reference with matching precision policy: bf16 MXU inputs, f32 accumulate.
    h_ref = jnp.maximum(
        jnp.dot(x.astype(jnp.bfloat16), w1_bf,
                preferred_element_type=jnp.float32) + b1[None, :], 0.0)
    ref = jnp.dot(h_ref.astype(jnp.bfloat16), w2_bf,
                  preferred_element_type=jnp.float32) + b2[None, :]

    # Path 1: auto -> resident-weights kernel (tiny expert => single grid step).
    out_res = expert_forward(x, w1_bf, b1, w2_bf, b2)
    jax.block_until_ready(out_res)
    assert out_res.shape == (B, D_OUT) and out_res.dtype == jnp.float32
    assert jnp.allclose(out_res, ref, atol=2e-3, rtol=2e-3), (
        float(jnp.max(jnp.abs(out_res - ref))))

    # Path 2: forced 3-D tiled/accumulating kernel (large-expert code path).
    out_tiled = expert_forward(x, w1_bf, b1, w2_bf, b2, tiles=(128, 128, 128))
    jax.block_until_ready(out_tiled)
    assert jnp.allclose(out_tiled, ref, atol=2e-3, rtol=2e-3), (
        float(jnp.max(jnp.abs(out_tiled - ref))))

    # Looser sanity check against pure-f32 math.
    ref_f32 = jnp.maximum(x @ w1 + b1[None, :], 0.0) @ w2 + b2[None, :]
    assert jnp.allclose(out_res, ref_f32, atol=5e-2, rtol=5e-2)

    print("KERNEL_OK")
</pallas_src>

<mosaic_0001>
module attributes {stable_mosaic.version = 11 : i64} {
  func.func @_expert_kernel_resident(%arg0: i32, %arg1: memref<256x128xbf16, #tpu.memory_space<vmem>>, %arg2: memref<128x256xbf16, #tpu.memory_space<vmem>>, %arg3: memref<1x256xf32, #tpu.memory_space<vmem>>, %arg4: memref<256x256xbf16, #tpu.memory_space<vmem>>, %arg5: memref<1x256xf32, #tpu.memory_space<vmem>>, %arg6: memref<256x256xf32, #tpu.memory_space<vmem>>) attributes {dimension_semantics = [#tpu.dimension_semantics<parallel>], iteration_bounds = array<i64: 1>, scalar_prefetch = 0 : i64, scratch_operands = 0 : i64, tpu.core_type = #tpu.core_type<tc>, window_params = [{transform_indices = @transform_0, window_bounds = array<i64: 256, 128>}, {pipeline_mode = #tpu.pipeline_mode<synchronous>, transform_indices = @transform_1, window_bounds = array<i64: 128, 256>}, {pipeline_mode = #tpu.pipeline_mode<synchronous>, transform_indices = @transform_2, window_bounds = array<i64: 1, 256>}, {pipeline_mode = #tpu.pipeline_mode<synchronous>, transform_indices = @transform_3, window_bounds = array<i64: 256, 256>}, {pipeline_mode = #tpu.pipeline_mode<synchronous>, transform_indices = @transform_4, window_bounds = array<i64: 1, 256>}, {transform_indices = @transform_5, window_bounds = array<i64: 256, 256>}]} {
    %c0 = arith.constant 0 : index
    %c0_0 = arith.constant 0 : index
    %0 = vector.load %arg1[%c0, %c0_0] : memref<256x128xbf16, #tpu.memory_space<vmem>>, vector<256x128xbf16>
    %c0_1 = arith.constant 0 : index
    %c0_2 = arith.constant 0 : index
    %1 = vector.load %arg2[%c0_1, %c0_2] : memref<128x256xbf16, #tpu.memory_space<vmem>>, vector<128x256xbf16>
    %cst = arith.constant dense<0.000000e+00> : vector<256x256xf32>
    %2 = tpu.matmul %0, %1, %cst {dimension_numbers = #tpu.dot_dimension_numbers<[1], [0], [0], [1], [0, 0, 1, 1], [], []>} : vector<256x128xbf16>, vector<128x256xbf16>, vector<256x256xf32> -> vector<256x256xf32>
    %c0_3 = arith.constant 0 : index
    %c0_4 = arith.constant 0 : index
    %3 = vector.load %arg3[%c0_3, %c0_4] : memref<1x256xf32, #tpu.memory_space<vmem>>, vector<1x256xf32>
    %4 = vector.broadcast %3 : vector<1x256xf32> to vector<256x256xf32>
    %5 = arith.addf %2, %4 : vector<256x256xf32>
    %cst_5 = arith.constant 0.000000e+00 : f32
    %6 = vector.broadcast %cst_5 : f32 to vector<256x256xf32>
    %7 = arith.maximumf %5, %6 : vector<256x256xf32>
    %8 = arith.truncf %7 : vector<256x256xf32> to vector<256x256xbf16>
    %c0_6 = arith.constant 0 : index
    %c0_7 = arith.constant 0 : index
    %9 = vector.load %arg4[%c0_6, %c0_7] : memref<256x256xbf16, #tpu.memory_space<vmem>>, vector<256x256xbf16>
    %cst_8 = arith.constant dense<0.000000e+00> : vector<256x256xf32>
    %10 = tpu.matmul %8, %9, %cst_8 {dimension_numbers = #tpu.dot_dimension_numbers<[1], [0], [0], [1], [0, 0, 1, 1], [], []>} : vector<256x256xbf16>, vector<256x256xbf16>, vector<256x256xf32> -> vector<256x256xf32>
    %c0_9 = arith.constant 0 : index
    %c0_10 = arith.constant 0 : index
    %11 = vector.load %arg5[%c0_9, %c0_10] : memref<1x256xf32, #tpu.memory_space<vmem>>, vector<1x256xf32>
    %12 = vector.broadcast %11 : vector<1x256xf32> to vector<256x256xf32>
    %13 = arith.addf %10, %12 : vector<256x256xf32>
    %c0_11 = arith.constant 0 : index
    %c0_12 = arith.constant 0 : index
    %14 = vector.load %arg6[%c0_11, %c0_12] : memref<256x256xf32, #tpu.memory_space<vmem>>, vector<256x256xf32>
    tpu.vector_store %arg6[%c0_11, %c0_12], %13 {strides = array<i32>} : memref<256x256xf32, #tpu.memory_space<vmem>>, vector<256x256xf32>,
    return
  }
  func.func @transform_0(%arg0: i32) -> (i32, i32) {
    %c0_i32 = arith.constant 0 : i32
    %c0_i32_0 = arith.constant 0 : i32
    return %arg0, %c0_i32 : i32, i32
  }
  func.func @transform_1(%arg0: i32) -> (i32, i32) {
    %c0_i32 = arith.constant 0 : i32
    %c0_i32_0 = arith.constant 0 : i32
    %c0_i32_1 = arith.constant 0 : i32
    return %c0_i32, %c0_i32_0 : i32, i32
  }
  func.func @transform_2(%arg0: i32) -> (i32, i32) {
    %c0_i32 = arith.constant 0 : i32
    %c0_i32_0 = arith.constant 0 : i32
    %c0_i32_1 = arith.constant 0 : i32
    return %c0_i32, %c0_i32_0 : i32, i32
  }
  func.func @transform_3(%arg0: i32) -> (i32, i32) {
    %c0_i32 = arith.constant 0 : i32
    %c0_i32_0 = arith.constant 0 : i32
    %c0_i32_1 = arith.constant 0 : i32
    return %c0_i32, %c0_i32_0 : i32, i32
  }
  func.func @transform_4(%arg0: i32) -> (i32, i32) {
    %c0_i32 = arith.constant 0 : i32
    %c0_i32_0 = arith.constant 0 : i32
    %c0_i32_1 = arith.constant 0 : i32
    return %c0_i32, %c0_i32_0 : i32, i32
  }
  func.func @transform_5(%arg0: i32) -> (i32, i32) {
    %c0_i32 = arith.constant 0 : i32
    %c0_i32_0 = arith.constant 0 : i32
    return %arg0, %c0_i32 : i32, i32
  }
}

</mosaic_0001>

<bundles_post_ra>
// kernel: _expert_call.1
= control target key start
LH: loop header
LB: loop body
LE: loop exit
PB: predicated region body
PF: predicated region fallthrough
CT: control target
= control target key end

     0   :  { %v1236_v2 = vmov 0   ;;  %s1644_s0 = inlined_call_operand.vmem [shape: bf16[256,128], index: 0, kind: input, shape index: {}]   ;;  %s1645_s1 = inlined_call_operand.vmem [shape: bf16[128,256], index: 1, kind: input, shape index: {}]   ;;  %s1646_s2 = inlined_call_operand.vmem [shape: f32[1,256], index: 2, kind: input, shape index: {}]   ;;  %s1647_s3 = inlined_call_operand.vmem [shape: bf16[256,256], index: 3, kind: input, shape index: {}]   ;;  %s1648_s4 = inlined_call_operand.vmem [shape: f32[1,256], index: 4, kind: input, shape index: {}]   ;;  %s1649_s5 = inlined_call_operand.hbm [shape: f32[256,256], index: 5, kind: output, shape index: {}]  }
   0x1   :  { %v1124_v0 = vld [vmem:[%s1645_s1 + $0x4] ss:$8 sps:$4 sm:$0xff]   ;;  %v1126_v1 = vld [vmem:[%s1645_s1] ss:$8 sps:$4 sm:$0xff]   ;;  %290 = vmatprep.mubr.bf16.mxu0 %v1236_v2  ;;  %v1127_v3 = vld [vmem:[%s1645_s1 + $0x14] ss:$8 sps:$4 sm:$0xff]  }
   0x2   :  { %258 = vmatprep.subr.bf16.mxu0 %v1124_v0  ;;  %v1129_v4 = vld [vmem:[%s1645_s1 + $0x10] ss:$8 sps:$4 sm:$0xff]   ;;  %v1130_v5 = vld [vmem:[%s1645_s1 + $0x24] ss:$8 sps:$4 sm:$0xff]   ;;  %v1132_v6 = vld [vmem:[%s1645_s1 + $0x20] ss:$8 sps:$4 sm:$0xff]  }
   0x3   :  { %259 = vmatpush1.bf16.msra.mxu0 %v1126_v1  ;;  %v1133_v7 = vld [vmem:[%s1645_s1 + $0x34] ss:$8 sps:$4 sm:$0xff]   ;;  %v1135_v8 = vld [vmem:[%s1645_s1 + $0x30] ss:$8 sps:$4 sm:$0xff]   ;;  %v1136_v9 = vld [vmem:[%s1645_s1 + $0x44] ss:$8 sps:$4 sm:$0xff]  }
   0x4   :  { %260 = vmatprep.subr.bf16.mxu0 %v1127_v3  ;;  %v1138_v10 = vld [vmem:[%s1645_s1 + $0x40] ss:$8 sps:$4 sm:$0xff]   ;;  %v1139_v11 = vld [vmem:[%s1645_s1 + $0x54] ss:$8 sps:$4 sm:$0xff]   ;;  %v1141_v12 = vld [vmem:[%s1645_s1 + $0x50] ss:$8 sps:$4 sm:$0xff]  }
   0x5   :  { %v1142_v13 = vld [vmem:[%s1645_s1 + $0x64] ss:$8 sps:$4 sm:$0xff]   ;;  %v1144_v14 = vld [vmem:[%s1645_s1 + $0x60] ss:$8 sps:$4 sm:$0xff]   ;;  %v1145_v15 = vld [vmem:[%s1645_s1 + $0x74] ss:$8 sps:$4 sm:$0xff]  }
   0x6   :  { %v1147_v16 = vld [vmem:[%s1645_s1 + $0x70] ss:$8 sps:$4 sm:$0xff]   ;;  %v1166_v17 = vld [vmem:[%s1647_s3 + $0x4] ss:$8 sps:$4 sm:$0xff]   ;;  %v1164_v18 = vld [vmem:[%s1647_s3] ss:$8 sps:$4 sm:$0xff]  }
   0x7   :  { %261 = vmatpush1.bf16.msra.mxu0 %v1129_v4  ;;  %v1169_v19 = vld [vmem:[%s1647_s3 + $0x14] ss:$8 sps:$4 sm:$0xff]   ;;  %1088 = vmatprep.subr.bf16.mxu1 %v1166_v17  ;;  %v1148_v20 = vld [vmem:[%s1644_s0] sm:$0xff]   ;;  %v1167_v21 = vld [vmem:[%s1647_s3 + $0x10] ss:$8 sps:$4 sm:$0xff]  }
   0x8   :  { %262 = vmatprep.subr.bf16.mxu0 %v1130_v5  ;;  %1104 = vmatpush1.bf16.msra.mxu1 %v1164_v18  ;;  %v1172_v22 = vld [vmem:[%s1647_s3 + $0x24] ss:$8 sps:$4 sm:$0xff]   ;;  %v1170_v23 = vld [vmem:[%s1647_s3 + $0x20] ss:$8 sps:$4 sm:$0xff]   ;;  %v1175_v24 = vld [vmem:[%s1647_s3 + $0x34] ss:$8 sps:$4 sm:$0xff]  }
   0x9   :  { %1089 = vmatprep.subr.bf16.mxu1 %v1169_v19  ;;  %v1149_v25 = vld [vmem:[%s1644_s0 + $0x8] sm:$0xff]   ;;  %v1173_v26 = vld [vmem:[%s1647_s3 + $0x30] ss:$8 sps:$4 sm:$0xff]   ;;  %v1181_v30 = vld [vmem:[%s1647_s3 + $0x54] ss:$8 sps:$4 sm:$0xff]  }
   0xa   :  { %v1178_v27 = vld [vmem:[%s1647_s3 + $0x44] ss:$8 sps:$4 sm:$0xff]   ;;  %v1176_v28 = vld [vmem:[%s1647_s3 + $0x40] ss:$8 sps:$4 sm:$0xff]   ;;  %v1150_v29 = vld [vmem:[%s1644_s0 + $0x10] sm:$0xff]  }
   0xb   :  { %263 = vmatpush1.bf16.msra.mxu0 %v1132_v6 }
   0xc   :  { %264 = vmatprep.subr.bf16.mxu0 %v1133_v7  ;;  %1105 = vmatpush1.bf16.msra.mxu1 %v1167_v21 }
   0xd   :  { %1090 = vmatprep.subr.bf16.mxu1 %v1172_v22 }
   0xf   :  { %265 = vmatpush1.bf16.msra.mxu0 %v1135_v8 }
  0x10   :  { %266 = vmatprep.subr.bf16.mxu0 %v1136_v9  ;;  %1106 = vmatpush1.bf16.msra.mxu1 %v1170_v23 }
  0x11   :  { %1091 = vmatprep.subr.bf16.mxu1 %v1175_v24 }
  0x13   :  { %267 = vmatpush1.bf16.msra.mxu0 %v1138_v10 }
  0x14   :  { %268 = vmatprep.subr.bf16.mxu0 %v1139_v11  ;;  %1107 = vmatpush1.bf16.msra.mxu1 %v1173_v26 }
  0x15   :  { %1092 = vmatprep.subr.bf16.mxu1 %v1178_v27 }
  0x17   :  { %269 = vmatpush1.bf16.msra.mxu0 %v1141_v12 }
  0x18   :  { %270 = vmatprep.subr.bf16.mxu0 %v1142_v13  ;;  %1108 = vmatpush1.bf16.msra.mxu1 %v1176_v28 }
  0x19   :  { %1093 = vmatprep.subr.bf16.mxu1 %v1181_v30 }
  0x1b   :  { %271 = vmatpush1.bf16.msra.mxu0 %v1144_v14 }
  0x1c   :  { %272 = vmatprep.subr.bf16.mxu0 %v1145_v15 }
  0x1f   :  { %273 = vmatpush1.bf16.msra.mxu0 %v1147_v16 }
  0x20   :  { %751 = vmatprep.subr.bf16.mxu0 %v1166_v17 }
  0x22   :  { %291 = vmatmul.mubr.bf16.vlgmr.msra.gmra.mrb[0].mxu0 %v1148_v20 }
  0x23   :  { %300 = vmatprep.mubr.bf16.mxu0 %v1236_v2  ;;  %752 = vmatpush1.bf16.msra.mxu0 %v1164_v18 }
  0x24   :  { %753 = vmatprep.subr.bf16.mxu0 %v1169_v19 }
  0x27   :  { %754 = vmatpush1.bf16.msra.mxu0 %v1167_v21 }
  0x28   :  { %755 = vmatprep.subr.bf16.mxu0 %v1172_v22 }
  0x2a   :  { %301 = vmatmul.mubr.bf16.gmra.mrb[4].mxu0 %v1149_v25 }
  0x2b   :  { %310 = vmatprep.mubr.bf16.mxu0 %v1236_v2  ;;  %756 = vmatpush1.bf16.msra.mxu0 %v1170_v23 }
  0x2c   :  { %757 = vmatprep.subr.bf16.mxu0 %v1175_v24 }
  0x2f   :  { %758 = vmatpush1.bf16.msra.mxu0 %v1173_v26 }
  0x30   :  { %10 = vsyncpa [#allocation3], 0  ;;  %759 = vmatprep.subr.bf16.mxu0 %v1178_v27  ;;  %v1179_v31 = vld [vmem:[%s1647_s3 + $0x50] ss:$8 sps:$4 sm:$0xff]   ;;  %v1184_v32 = vld [vmem:[%s1647_s3 + $0x64] ss:$8 sps:$4 sm:$0xff]   ;;  %v72_v1 = vlaneseq }
  0x31   :  { %1109 = vmatpush1.bf16.msra.mxu1 %v1179_v31  ;;  %v1182_v33 = vld [vmem:[%s1647_s3 + $0x60] ss:$8 sps:$4 sm:$0xff]   ;;  %v1187_v34 = vld [vmem:[%s1647_s3 + $0x74] ss:$8 sps:$4 sm:$0xff]   ;;  %v1185_v36 = vld [vmem:[%s1647_s3 + $0x70] ss:$8 sps:$4 sm:$0xff]  }
  0x32   :  { %311 = vmatmul.mubr.bf16.gmra.mrb[8].mxu0 %v1150_v29  ;;  %1094 = vmatprep.subr.bf16.mxu1 %v1184_v32  ;;  %v1151_v35 = vld [vmem:[%s1644_s0 + $0x18] sm:$0xff]   ;;  %v1190_v37 = vld [vmem:[%s1647_s3 + $0x84] ss:$8 sps:$4 sm:$0xff]   ;;  %v1188_v38 = vld [vmem:[%s1647_s3 + $0x80] ss:$8 sps:$4 sm:$0xff]   ;;  %v1478_v3 = vshrl.u32 %v72_v1, 7 }
  0x33   :  { %320 = vmatprep.mubr.bf16.mxu0 %v1236_v2  ;;  %760 = vmatpush1.bf16.msra.mxu0 %v1176_v28  ;;  %v1193_v39 = vld [vmem:[%s1647_s3 + $0x94] ss:$8 sps:$4 sm:$0xff]   ;;  %v1152_v40 = vld [vmem:[%s1644_s0 + $0x20] sm:$0xff]   ;;  %v1191_v41 = vld [vmem:[%s1647_s3 + $0x90] ss:$8 sps:$4 sm:$0xff]  }
  0x34   :  { %761 = vmatprep.subr.bf16.mxu0 %v1181_v30  ;;  %v1196_v42 = vld [vmem:[%s1647_s3 + $0xa4] ss:$8 sps:$4 sm:$0xff]   ;;  %v1194_v43 = vld [vmem:[%s1647_s3 + $0xa0] ss:$8 sps:$4 sm:$0xff]   ;;  %v1199_v44 = vld [vmem:[%s1647_s3 + $0xb4] ss:$8 sps:$4 sm:$0xff]  }
  0x35   :  { %1110 = vmatpush1.bf16.msra.mxu1 %v1182_v33  ;;  %v1153_v45 = vld [vmem:[%s1644_s0 + $0x28] sm:$0xff]   ;;  %v1197_v46 = vld [vmem:[%s1647_s3 + $0xb0] ss:$8 sps:$4 sm:$0xff]   ;;  %v1205_v49 = vld [vmem:[%s1647_s3 + $0xd4] ss:$8 sps:$4 sm:$0xff]   ;;  %v74_v4 = vsub.s32 0, %v1478_v3 }
  0x36   :  { %1095 = vmatprep.subr.bf16.mxu1 %v1187_v34  ;;  %v1202_v47 = vld [vmem:[%s1647_s3 + $0xc4] ss:$8 sps:$4 sm:$0xff]   ;;  %v1200_v48 = vld [vmem:[%s1647_s3 + $0xc0] ss:$8 sps:$4 sm:$0xff]   ;;  %v1154_v50 = vld [vmem:[%s1644_s0 + $0x30] sm:$0xff]   ;;  %v78_v6 = vsub.s32 1, %v1478_v3 }
  0x37   :  { %762 = vmatpush1.bf16.msra.mxu0 %v1179_v31  ;;  %v1203_v51 = vld [vmem:[%s1647_s3 + $0xd0] ss:$8 sps:$4 sm:$0xff]   ;;  %v1156_v53 = vld [vmem:[%s1644_s0 + $0x40] sm:$0xff]   ;;  %v1157_v54 = vld [vmem:[%s1644_s0 + $0x48] sm:$0xff]  }
  0x38   :  { %763 = vmatprep.subr.bf16.mxu0 %v1184_v32  ;;  %v1155_v52 = vld [vmem:[%s1644_s0 + $0x38] sm:$0xff]   ;;  %v1158_v55 = vld [vmem:[%s1644_s0 + $0x50] sm:$0xff]   ;;  %v1208_v57 = vld [vmem:[%s1647_s3 + $0xe4] ss:$8 sps:$4 sm:$0xff]  }
  0x39   :  { %1111 = vmatpush1.bf16.msra.mxu1 %v1185_v36  ;;  %v1159_v56 = vld [vmem:[%s1644_s0 + $0x58] sm:$0xff]   ;;  %v1206_v58 = vld [vmem:[%s1647_s3 + $0xe0] ss:$8 sps:$4 sm:$0xff]   ;;  %v1162_v63 = vld [vmem:[%s1644_s0 + $0x70] sm:$0xff]  }
  0x3a   :  { %321 = vmatmul.mubr.bf16.gmra.mrb[12].mxu0 %v1151_v35  ;;  %1096 = vmatprep.subr.bf16.mxu1 %v1190_v37  ;;  %v1211_v59 = vld [vmem:[%s1647_s3 + $0xf4] ss:$8 sps:$4 sm:$0xff]   ;;  %v1209_v60 = vld [vmem:[%s1647_s3 + $0xf0] ss:$8 sps:$4 sm:$0xff]   ;;  %v1160_v61 = vld [vmem:[%s1644_s0 + $0x60] sm:$0xff]  }
  0x3b   :  { %330 = vmatprep.mubr.bf16.mxu0 %v1236_v2  ;;  %764 = vmatpush1.bf16.msra.mxu0 %v1182_v33  ;;  %v1161_v62 = vld [vmem:[%s1644_s0 + $0x68] sm:$0xff]   ;;  %v1163_v0 = vld [vmem:[%s1644_s0 + $0x78] sm:$0xff]   ;;  %v70_v5 = vld [vmem:[%s1646_s2] sm:$0x3] }
  0x3c   :  { %765 = vmatprep.subr.bf16.mxu0 %v1187_v34  ;;  %v1487_v7 = vrot.slane %v70_v5, %v74_v4 }
  0x3d   :  { %1112 = vmatpush1.bf16.msra.mxu1 %v1188_v38 }
  0x3e   :  { %1097 = vmatprep.subr.bf16.mxu1 %v1193_v39 }
  0x3f   :  { %766 = vmatpush1.bf16.msra.mxu0 %v1185_v36 }
  0x40   :  { %767 = vmatprep.subr.bf16.mxu0 %v1190_v37 }
  0x41   :  { %1113 = vmatpush1.bf16.msra.mxu1 %v1191_v41 }
  0x42   :  { %331 = vmatmul.mubr.bf16.gmra.mrb[16].mxu0 %v1152_v40  ;;  %1098 = vmatprep.subr.bf16.mxu1 %v1196_v42 }
  0x43   :  { %340 = vmatprep.mubr.bf16.mxu0 %v1236_v2  ;;  %768 = vmatpush1.bf16.msra.mxu0 %v1188_v38 }
  0x44   :  { %769 = vmatprep.subr.bf16.mxu0 %v1193_v39 }
  0x45   :  { %1114 = vmatpush1.bf16.msra.mxu1 %v1194_v43 }
  0x46   :  { %1099 = vmatprep.subr.bf16.mxu1 %v1199_v44 }
  0x47   :  { %770 = vmatpush1.bf16.msra.mxu0 %v1191_v41 }
  0x48   :  { %771 = vmatprep.subr.bf16.mxu0 %v1196_v42 }
  0x49   :  { %1115 = vmatpush1.bf16.msra.mxu1 %v1197_v46 }
  0x4a   :  { %341 = vmatmul.mubr.bf16.gmra.mrb[20].mxu0 %v1153_v45  ;;  %1100 = vmatprep.subr.bf16.mxu1 %v1202_v47 }
  0x4b   :  { %350 = vmatprep.mubr.bf16.mxu0 %v1236_v2  ;;  %772 = vmatpush1.bf16.msra.mxu0 %v1194_v43 }
  0x4c   :  { %773 = vmatprep.subr.bf16.mxu0 %v1199_v44 }
  0x4d   :  { %1116 = vmatpush1.bf16.msra.mxu1 %v1200_v48 }
  0x4e   :  { %1101 = vmatprep.subr.bf16.mxu1 %v1205_v49 }
  0x4f   :  { %774 = vmatpush1.bf16.msra.mxu0 %v1197_v46 }
  0x50   :  { %775 = vmatprep.subr.bf16.mxu0 %v1202_v47 }
  0x51   :  { %1117 = vmatpush1.bf16.msra.mxu1 %v1203_v51 }
  0x52   :  { %351 = vmatmul.mubr.bf16.gmra.mrb[24].mxu0 %v1154_v50  ;;  %1102 = vmatprep.subr.bf16.mxu1 %v1208_v57 }
  0x53   :  { %360 = vmatprep.mubr.bf16.mxu0 %v1236_v2  ;;  %776 = vmatpush1.bf16.msra.mxu0 %v1200_v48 }
  0x54   :  { %777 = vmatprep.subr.bf16.mxu0 %v1205_v49 }
  0x55   :  { %1118 = vmatpush1.bf16.msra.mxu1 %v1206_v58 }
  0x56   :  { %1103 = vmatprep.subr.bf16.mxu1 %v1211_v59 }
  0x57   :  { %778 = vmatpush1.bf16.msra.mxu0 %v1203_v51 }
  0x58   :  { %779 = vmatprep.subr.bf16.mxu0 %v1208_v57 }
  0x59   :  { %1119 = vmatpush1.bf16.msra.mxu1 %v1209_v60 }
  0x5a   :  { %361 = vmatmul.mubr.bf16.gmra.mrb[28].mxu0 %v1155_v52 }
  0x5b   :  { %370 = vmatprep.mubr.bf16.mxu0 %v1236_v2  ;;  %780 = vmatpush1.bf16.msra.mxu0 %v1206_v58 }
  0x5c   :  { %781 = vmatprep.subr.bf16.mxu0 %v1211_v59 }
  0x5f   :  { %782 = vmatpush1.bf16.msra.mxu0 %v1209_v60 }
  0x62   :  { %371 = vmatmul.mubr.bf16.gmra.mrb[32].mxu0 %v1156_v53 }
  0x63   :  { %380 = vmatprep.mubr.bf16.mxu0 %v1236_v2 }
  0x6a   :  { %381 = vmatmul.mubr.bf16.gmra.mrb[36].mxu0 %v1157_v54 }
  0x6b   :  { %390 = vmatprep.mubr.bf16.mxu0 %v1236_v2 }
  0x72   :  { %391 = vmatmul.mubr.bf16.gmra.mrb[40].mxu0 %v1158_v55 }
  0x73   :  { %400 = vmatprep.mubr.bf16.mxu0 %v1236_v2 }
  0x7a   :  { %401 = vmatmul.mubr.bf16.gmra.mrb[44].mxu0 %v1159_v56 }
  0x7b   :  { %410 = vmatprep.mubr.bf16.mxu0 %v1236_v2 }
  0x82   :  { %411 = vmatmul.mubr.bf16.gmra.mrb[48].mxu0 %v1160_v61 }
  0x83   :  { %420 = vmatprep.mubr.bf16.mxu0 %v1236_v2 }
  0x8a   :  { %421 = vmatmul.mubr.bf16.gmra.mrb[52].mxu0 %v1161_v62 }
  0x8b   :  { %430 = vmatprep.mubr.bf16.mxu0 %v1236_v2 }
  0x92   :  { %431 = vmatmul.mubr.bf16.gmra.mrb[56].mxu0 %v1162_v63 }
  0x93   :  { %440 = vmatprep.mubr.bf16.mxu0 %v1236_v2  ;;  %v1491_v2 = vrot.slane %v70_v5, %v78_v6 }
  0x9a   :  { %441 = vmatmul.mubr.bf16.gmra.mrb[60].mxu0 %v1163_v0 }
  0xf5   :  { %v292_v8 = vpop.f32.mrb[0].mxu0 }
  0xf6   :  { %v293_v9 = vadd.f32 %v292_v8, %v1487_v7  ;;  %v294_v10 = vpop.f32.mrb[1].mxu0 }
  0xf7   :  { %v295_v11 = vadd.f32 %v294_v10, %v1491_v2  ;;  %v296_v12 = vpop.f32.mrb[2].mxu0 }
  0xf8   :  { %v297_v13 = vadd.f32 %v296_v12, %v1487_v7  ;;  %v298_v14 = vpop.f32.mrb[3].mxu0  ;;  %v451_v16 = vmax.f32 %v293_v9, 0.0 }
  0xf9   :  { %v299_v15 = vadd.f32 %v298_v14, %v1491_v2  ;;  %v452_v18 = vmax.f32 %v295_v11, 0.0 }
  0xfa   :  { %v453_v17 = vmax.f32 %v297_v13, 0.0 }
  0xfb   :  { %v454_v19 = vmax.f32 %v299_v15, 0.0 }
  0xfc   :  { %v515_v20 = vpack.c.bf16 %v453_v17, %v451_v16 }
  0xfd   :  { %v516_v21 = vpack.c.bf16 %v454_v19, %v452_v18  ;;  %v302_v22 = vpop.f32.mrb[4].mxu0 }
  0xfe   :  { %v303_v23 = vadd.f32 %v302_v22, %v1487_v7  ;;  %v304_v24 = vpop.f32.mrb[5].mxu0 }
  0xff   :  { %v305_v25 = vadd.f32 %v304_v24, %v1491_v2  ;;  %v306_v26 = vpop.f32.mrb[6].mxu0  ;;  %783 = vmatprep.mubr.bf16.mxu0 %v516_v21 }
 0x100   :  { %v307_v27 = vadd.f32 %v306_v26, %v1487_v7  ;;  %v308_v28 = vpop.f32.mrb[7].mxu0  ;;  %784 = vmatmul.mubr.bf16.vlgmr.msra.gmra.mrb[64].mxu0 %v515_v20  ;;  %v455_v30 = vmax.f32 %v303_v23, 0.0 }
 0x101   :  { %v309_v29 = vadd.f32 %v308_v28, %v1491_v2  ;;  %v456_v32 = vmax.f32 %v305_v25, 0.0 }
 0x102   :  { %v457_v31 = vmax.f32 %v307_v27, 0.0 }
 0x103   :  { %v458_v33 = vmax.f32 %v309_v29, 0.0 }
 0x104   :  { %v517_v34 = vpack.c.bf16 %v457_v31, %v455_v30 }
 0x105   :  { %v518_v35 = vpack.c.bf16 %v458_v33, %v456_v32  ;;  %v312_v36 = vpop.f32.mrb[8].mxu0 }
 0x106   :  { %v313_v37 = vadd.f32 %v312_v36, %v1487_v7  ;;  %v314_v38 = vpop.f32.mrb[9].mxu0 }
 0x107   :  { %v315_v39 = vadd.f32 %v314_v38, %v1491_v2  ;;  %v316_v40 = vpop.f32.mrb[10].mxu0  ;;  %793 = vmatprep.mubr.bf16.mxu0 %v518_v35 }
 0x108   :  { %v317_v41 = vadd.f32 %v316_v40, %v1487_v7  ;;  %v318_v42 = vpop.f32.mrb[11].mxu0  ;;  %794 = vmatmul.mubr.bf16.gmra.mrb[68].mxu0 %v517_v34  ;;  %v459_v44 = vmax.f32 %v313_v37, 0.0 }
 0x109   :  { %v319_v43 = vadd.f32 %v318_v42, %v1491_v2  ;;  %v460_v46 = vmax.f32 %v315_v39, 0.0 }
 0x10a   :  { %v461_v45 = vmax.f32 %v317_v41, 0.0 }
 0x10b   :  { %v462_v47 = vmax.f32 %v319_v43, 0.0 }
 0x10c   :  { %v519_v48 = vpack.c.bf16 %v461_v45, %v459_v44 }
 0x10d   :  { %v322_v49 = vpop.f32.mrb[12].mxu0  ;;  %v520_v50 = vpack.c.bf16 %v462_v47, %v460_v46 }
 0x10e   :  { %v323_v51 = vadd.f32 %v322_v49, %v1487_v7  ;;  %v324_v52 = vpop.f32.mrb[13].mxu0 }
 0x10f   :  { %v325_v53 = vadd.f32 %v324_v52, %v1491_v2  ;;  %v326_v54 = vpop.f32.mrb[14].mxu0  ;;  %803 = vmatprep.mubr.bf16.mxu1 %v520_v50 }
 0x110   :  { %v327_v55 = vadd.f32 %v326_v54, %v1487_v7  ;;  %v328_v56 = vpop.f32.mrb[15].mxu0  ;;  %804 = vmatmul.mubr.bf16.vlgmr.msra.gmra.mrb[0].mxu1 %v519_v48  ;;  %v463_v58 = vmax.f32 %v323_v51, 0.0 }
 0x111   :  { %v329_v57 = vadd.f32 %v328_v56, %v1491_v2  ;;  %v464_v60 = vmax.f32 %v325_v53, 0.0 }
 0x112   :  { %v465_v59 = vmax.f32 %v327_v55, 0.0 }
 0x113   :  { %v466_v61 = vmax.f32 %v329_v57, 0.0 }
 0x114   :  { %v521_v62 = vpack.c.bf16 %v465_v59, %v463_v58 }
 0x115   :  { %v522_v63 = vpack.c.bf16 %v466_v61, %v464_v60  ;;  %v332_v0 = vpop.f32.mrb[16].mxu0 }
 0x116   :  { %v333_v1 = vadd.f32 %v332_v0, %v1487_v7  ;;  %v334_v5 = vpop.f32.mrb[17].mxu0 }
 0x117   :  { %v335_v8 = vadd.f32 %v334_v5, %v1491_v2  ;;  %v336_v9 = vpop.f32.mrb[18].mxu0  ;;  %813 = vmatprep.mubr.bf16.mxu1 %v522_v63 }
 0x118   :  { %v337_v10 = vadd.f32 %v336_v9, %v1487_v7  ;;  %v338_v11 = vpop.f32.mrb[19].mxu0  ;;  %814 = vmatmul.mubr.bf16.gmra.mrb[4].mxu1 %v521_v62  ;;  %v467_v13 = vmax.f32 %v333_v1, 0.0 }
 0x119   :  { %v339_v12 = vadd.f32 %v338_v11, %v1491_v2  ;;  %v468_v15 = vmax.f32 %v335_v8, 0.0 }
 0x11a   :  { %v469_v14 = vmax.f32 %v337_v10, 0.0 }
 0x11b   :  { %v470_v16 = vmax.f32 %v339_v12, 0.0 }
 0x11c   :  { %v523_v17 = vpack.c.bf16 %v469_v14, %v467_v13 }
 0x11d   :  { %v524_v18 = vpack.c.bf16 %v470_v16, %v468_v15  ;;  %v342_v19 = vpop.f32.mrb[20].mxu0 }
 0x11e   :  { %v343_v20 = vadd.f32 %v342_v19, %v1487_v7  ;;  %v344_v21 = vpop.f32.mrb[21].mxu0 }
 0x11f   :  { %v345_v22 = vadd.f32 %v344_v21, %v1491_v2  ;;  %v346_v23 = vpop.f32.mrb[22].mxu0  ;;  %823 = vmatprep.mubr.bf16.mxu1 %v524_v18 }
 0x120   :  { %v347_v24 = vadd.f32 %v346_v23, %v1487_v7  ;;  %v348_v25 = vpop.f32.mrb[23].mxu0  ;;  %824 = vmatmul.mubr.bf16.gmra.mrb[8].mxu1 %v523_v17  ;;  %v471_v27 = vmax.f32 %v343_v20, 0.0 }
 0x121   :  { %v349_v26 = vadd.f32 %v348_v25, %v1491_v2  ;;  %v472_v29 = vmax.f32 %v345_v22, 0.0 }
 0x122   :  { %v473_v28 = vmax.f32 %v347_v24, 0.0 }
 0x123   :  { %v474_v30 = vmax.f32 %v349_v26, 0.0 }
 0x124   :  { %v525_v31 = vpack.c.bf16 %v473_v28, %v471_v27 }
 0x125   :  { %v526_v32 = vpack.c.bf16 %v474_v30, %v472_v29  ;;  %v352_v33 = vpop.f32.mrb[24].mxu0 }
 0x126   :  { %v353_v34 = vadd.f32 %v352_v33, %v1487_v7  ;;  %v354_v35 = vpop.f32.mrb[25].mxu0 }
 0x127   :  { %v355_v36 = vadd.f32 %v354_v35, %v1491_v2  ;;  %v356_v37 = vpop.f32.mrb[26].mxu0  ;;  %833 = vmatprep.mubr.bf16.mxu1 %v526_v32 }
 0x128   :  { %v357_v38 = vadd.f32 %v356_v37, %v1487_v7  ;;  %v358_v39 = vpop.f32.mrb[27].mxu0  ;;  %834 = vmatmul.mubr.bf16.gmra.mrb[12].mxu1 %v525_v31  ;;  %v475_v41 = vmax.f32 %v353_v34, 0.0 }
 0x129   :  { %v359_v40 = vadd.f32 %v358_v39, %v1491_v2  ;;  %v476_v43 = vmax.f32 %v355_v36, 0.0 }
 0x12a   :  { %v477_v42 = vmax.f32 %v357_v38, 0.0 }
 0x12b   :  { %v478_v44 = vmax.f32 %v359_v40, 0.0 }
 0x12c   :  { %v527_v45 = vpack.c.bf16 %v477_v42, %v475_v41 }
 0x12d   :  { %v528_v46 = vpack.c.bf16 %v478_v44, %v476_v43  ;;  %v362_v47 = vpop.f32.mrb[28].mxu0 }
 0x12e   :  { %v363_v48 = vadd.f32 %v362_v47, %v1487_v7  ;;  %v364_v49 = vpop.f32.mrb[29].mxu0 }
 0x12f   :  { %v365_v50 = vadd.f32 %v364_v49, %v1491_v2  ;;  %v366_v51 = vpop.f32.mrb[30].mxu0  ;;  %843 = vmatprep.mubr.bf16.mxu1 %v528_v46 }
 0x130   :  { %v367_v52 = vadd.f32 %v366_v51, %v1487_v7  ;;  %v368_v53 = vpop.f32.mrb[31].mxu0  ;;  %844 = vmatmul.mubr.bf16.gmra.mrb[16].mxu1 %v527_v45  ;;  %v479_v55 = vmax.f32 %v363_v48, 0.0 }
 0x131   :  { %v369_v54 = vadd.f32 %v368_v53, %v1491_v2  ;;  %v480_v57 = vmax.f32 %v365_v50, 0.0 }
 0x132   :  { %v481_v56 = vmax.f32 %v367_v52, 0.0 }
 0x133   :  { %v482_v58 = vmax.f32 %v369_v54, 0.0 }
 0x134   :  { %v529_v59 = vpack.c.bf16 %v481_v56, %v479_v55 }
 0x135   :  { %v530_v60 = vpack.c.bf16 %v482_v58, %v480_v57  ;;  %v372_v61 = vpop.f32.mrb[32].mxu0 }
 0x136   :  { %v373_v62 = vadd.f32 %v372_v61, %v1487_v7  ;;  %v374_v63 = vpop.f32.mrb[33].mxu0 }
 0x137   :  { %v375_v0 = vadd.f32 %v374_v63, %v1491_v2  ;;  %v376_v1 = vpop.f32.mrb[34].mxu0  ;;  %853 = vmatprep.mubr.bf16.mxu1 %v530_v60 }
 0x138   :  { %v377_v5 = vadd.f32 %v376_v1, %v1487_v7  ;;  %v378_v8 = vpop.f32.mrb[35].mxu0  ;;  %854 = vmatmul.mubr.bf16.gmra.mrb[20].mxu1 %v529_v59  ;;  %v483_v10 = vmax.f32 %v373_v62, 0.0 }
 0x139   :  { %v379_v9 = vadd.f32 %v378_v8, %v1491_v2  ;;  %v484_v12 = vmax.f32 %v375_v0, 0.0 }
 0x13a   :  { %v485_v11 = vmax.f32 %v377_v5, 0.0 }
 0x13b   :  { %v486_v13 = vmax.f32 %v379_v9, 0.0 }
 0x13c   :  { %v531_v14 = vpack.c.bf16 %v485_v11, %v483_v10 }
 0x13d   :  { %v532_v15 = vpack.c.bf16 %v486_v13, %v484_v12  ;;  %v382_v16 = vpop.f32.mrb[36].mxu0 }
 0x13e   :  { %v383_v17 = vadd.f32 %v382_v16, %v1487_v7  ;;  %v384_v18 = vpop.f32.mrb[37].mxu0 }
 0x13f   :  { %v385_v19 = vadd.f32 %v384_v18, %v1491_v2  ;;  %v386_v20 = vpop.f32.mrb[38].mxu0  ;;  %863 = vmatprep.mubr.bf16.mxu1 %v532_v15 }
 0x140   :  { %v387_v21 = vadd.f32 %v386_v20, %v1487_v7  ;;  %v388_v22 = vpop.f32.mrb[39].mxu0  ;;  %864 = vmatmul.mubr.bf16.gmra.mrb[24].mxu1 %v531_v14  ;;  %v487_v24 = vmax.f32 %v383_v17, 0.0 }
 0x141   :  { %v389_v23 = vadd.f32 %v388_v22, %v1491_v2  ;;  %v488_v26 = vmax.f32 %v385_v19, 0.0 }
 0x142   :  { %v489_v25 = vmax.f32 %v387_v21, 0.0 }
 0x143   :  { %v490_v27 = vmax.f32 %v389_v23, 0.0 }
 0x144   :  { %v533_v28 = vpack.c.bf16 %v489_v25, %v487_v24 }
 0x145   :  { %v534_v29 = vpack.c.bf16 %v490_v27, %v488_v26  ;;  %v392_v30 = vpop.f32.mrb[40].mxu0 }
 0x146   :  { %v393_v31 = vadd.f32 %v392_v30, %v1487_v7  ;;  %v394_v32 = vpop.f32.mrb[41].mxu0 }
 0x147   :  { %v395_v33 = vadd.f32 %v394_v32, %v1491_v2  ;;  %v396_v34 = vpop.f32.mrb[42].mxu0  ;;  %873 = vmatprep.mubr.bf16.mxu1 %v534_v29 }
 0x148   :  { %v397_v35 = vadd.f32 %v396_v34, %v1487_v7  ;;  %v398_v36 = vpop.f32.mrb[43].mxu0  ;;  %874 = vmatmul.mubr.bf16.gmra.mrb[28].mxu1 %v533_v28  ;;  %v491_v38 = vmax.f32 %v393_v31, 0.0 }
 0x149   :  { %v399_v37 = vadd.f32 %v398_v36, %v1491_v2  ;;  %v492_v40 = vmax.f32 %v395_v33, 0.0 }
 0x14a   :  { %v493_v39 = vmax.f32 %v397_v35, 0.0 }
 0x14b   :  { %v494_v41 = vmax.f32 %v399_v37, 0.0 }
 0x14c   :  { %v535_v42 = vpack.c.bf16 %v493_v39, %v491_v38 }
 0x14d   :  { %v536_v43 = vpack.c.bf16 %v494_v41, %v492_v40  ;;  %v402_v44 = vpop.f32.mrb[44].mxu0 }
 0x14e   :  { %v403_v45 = vadd.f32 %v402_v44, %v1487_v7  ;;  %v404_v46 = vpop.f32.mrb[45].mxu0 }
 0x14f   :  { %v405_v47 = vadd.f32 %v404_v46, %v1491_v2  ;;  %v406_v48 = vpop.f32.mrb[46].mxu0  ;;  %883 = vmatprep.mubr.bf16.mxu1 %v536_v43 }
 0x150   :  { %v407_v49 = vadd.f32 %v406_v48, %v1487_v7  ;;  %v408_v50 = vpop.f32.mrb[47].mxu0  ;;  %884 = vmatmul.mubr.bf16.gmra.mrb[32].mxu1 %v535_v42  ;;  %v495_v52 = vmax.f32 %v403_v45, 0.0 }
 0x151   :  { %v409_v51 = vadd.f32 %v408_v50, %v1491_v2  ;;  %v496_v54 = vmax.f32 %v405_v47, 0.0 }
 0x152   :  { %v497_v53 = vmax.f32 %v407_v49, 0.0 }
 0x153   :  { %v498_v55 = vmax.f32 %v409_v51, 0.0 }
 0x154   :  { %v537_v56 = vpack.c.bf16 %v497_v53, %v495_v52 }
 0x155   :  { %v538_v57 = vpack.c.bf16 %v498_v55, %v496_v54  ;;  %v412_v58 = vpop.f32.mrb[48].mxu0  ;;  %v579_v55 = vld [vmem:[%s1648_s4] sm:$0x3]  ;;  %s1237_s4 = smov [#allocation2]  }
 0x156   :  { %v413_v59 = vadd.f32 %v412_v58, %v1487_v7  ;;  %v414_v60 = vpop.f32.mrb[49].mxu0  ;;  %s1013_s18 = sshll.u32 %s1237_s4, 4  ;;  %s1014_s18 = int_to_ptr.vmem [resolvable:$true] %s1013_s18 }
 0x157   :  { %v415_v61 = vadd.f32 %v414_v60, %v1491_v2  ;;  %v416_v62 = vpop.f32.mrb[50].mxu0  ;;  %893 = vmatprep.mubr.bf16.mxu1 %v538_v57  ;;  %s1212_s19 = scalar_lea.vmem %s1014_s18, 8192  ;;  %p1217_p1 = scmp.lt.s32.totalorder %s1014_s18, %s1014_s18 }
 0x158   :  { %v417_v63 = vadd.f32 %v416_v62, %v1487_v7  ;;  %v418_v0 = vpop.f32.mrb[51].mxu0  ;;  %894 = vmatmul.mubr.bf16.gmra.mrb[36].mxu1 %v537_v56  ;;  %v499_v5 = vmax.f32 %v413_v59, 0.0  ;;  %v1562_v56 = vrot.slane %v579_v55, %v74_v4  ;;  %p1213_p0 = scmp.ne.s32.totalorder %s1014_s18, %s1212_s19  ;;  %p1218_p2 = scmp.lt.s32.totalorder %s1212_s19, %s1212_s19 }
 0x159   :  { %v419_v1 = vadd.f32 %v418_v0, %v1491_v2  ;;  %v500_v9 = vmax.f32 %v415_v61, 0.0 }
 0x15a   :  { %v501_v8 = vmax.f32 %v417_v63, 0.0  ;;  %p1219_p3 = por %p1218_p2, %p1217_p1 }
 0x15b   :  { %v502_v10 = vmax.f32 %v419_v1, 0.0 }
 0x15c   :  { %v539_v11 = vpack.c.bf16 %v501_v8, %v499_v5  ;;  %p1220_p4 = pnand %p1219_p3, %p1213_p0 }
 0x15d   :  { %v540_v12 = vpack.c.bf16 %v502_v10, %v500_v9  ;;  %v422_v13 = vpop.f32.mrb[52].mxu0 }
 0x15e   :  { %v423_v14 = vadd.f32 %v422_v13, %v1487_v7  ;;  %v424_v15 = vpop.f32.mrb[53].mxu0 }
 0x15f   :  { %v425_v16 = vadd.f32 %v424_v15, %v1491_v2  ;;  %v426_v17 = vpop.f32.mrb[54].mxu0  ;;  %903 = vmatprep.mubr.bf16.mxu1 %v540_v12 }
 0x160   :  { %v427_v18 = vadd.f32 %v426_v17, %v1487_v7  ;;  %v428_v19 = vpop.f32.mrb[55].mxu0  ;;  %904 = vmatmul.mubr.bf16.gmra.mrb[40].mxu1 %v539_v11  ;;  %v503_v21 = vmax.f32 %v423_v14, 0.0 }
 0x161   :  { %v429_v20 = vadd.f32 %v428_v19, %v1491_v2  ;;  %v504_v23 = vmax.f32 %v425_v16, 0.0 }
 0x162   :  { %v505_v22 = vmax.f32 %v427_v18, 0.0 }
 0x163   :  { %v506_v24 = vmax.f32 %v429_v20, 0.0 }
 0x164   :  { %v541_v25 = vpack.c.bf16 %v505_v22, %v503_v21 }
 0x165   :  { %v542_v26 = vpack.c.bf16 %v506_v24, %v504_v23  ;;  %v432_v27 = vpop.f32.mrb[56].mxu0 }
 0x166   :  { %v433_v28 = vadd.f32 %v432_v27, %v1487_v7  ;;  %v434_v29 = vpop.f32.mrb[57].mxu0 }
 0x167   :  { %v435_v30 = vadd.f32 %v434_v29, %v1491_v2  ;;  %v436_v31 = vpop.f32.mrb[58].mxu0  ;;  %913 = vmatprep.mubr.bf16.mxu1 %v542_v26 }
 0x168   :  { %v437_v32 = vadd.f32 %v436_v31, %v1487_v7  ;;  %v438_v33 = vpop.f32.mrb[59].mxu0  ;;  %914 = vmatmul.mubr.bf16.gmra.mrb[44].mxu1 %v541_v25  ;;  %v507_v35 = vmax.f32 %v433_v28, 0.0 }
 0x169   :  { %v439_v34 = vadd.f32 %v438_v33, %v1491_v2  ;;  %v508_v37 = vmax.f32 %v435_v30, 0.0 }
 0x16a   :  { %v509_v36 = vmax.f32 %v437_v32, 0.0 }
 0x16b   :  { %v510_v38 = vmax.f32 %v439_v34, 0.0 }
 0x16c   :  { %v543_v39 = vpack.c.bf16 %v509_v36, %v507_v35 }
 0x16d   :  { %v544_v40 = vpack.c.bf16 %v510_v38, %v508_v37  ;;  %v442_v41 = vpop.f32.mrb[60].mxu0 }
 0x16e   :  { %v443_v42 = vadd.f32 %v442_v41, %v1487_v7  ;;  %v444_v43 = vpop.f32.mrb[61].mxu0 }
 0x16f   :  { %v445_v44 = vadd.f32 %v444_v43, %v1491_v2  ;;  %v446_v45 = vpop.f32.mrb[62].mxu0  ;;  %923 = vmatprep.mubr.bf16.mxu1 %v544_v40 }
 0x170   :  { %v447_v46 = vadd.f32 %v446_v45, %v1487_v7  ;;  %v448_v47 = vpop.f32.mrb[63].mxu0  ;;  %924 = vmatmul.mubr.bf16.gmra.mrb[48].mxu1 %v543_v39  ;;  %v511_v49 = vmax.f32 %v443_v42, 0.0  ;;  %v1566_v7 = vrot.slane %v579_v55, %v78_v6 }
 0x171   :  { %v449_v48 = vadd.f32 %v448_v47, %v1491_v2  ;;  %v512_v51 = vmax.f32 %v445_v44, 0.0 }
 0x172   :  { %v513_v50 = vmax.f32 %v447_v46, 0.0 }
 0x173   :  { %v514_v52 = vmax.f32 %v449_v48, 0.0 }
 0x174   :  { %v545_v53 = vpack.c.bf16 %v513_v50, %v511_v49 }
 0x175   :  { %v546_v54 = vpack.c.bf16 %v514_v52, %v512_v51 }
 0x177   :  { %933 = vmatprep.mubr.bf16.mxu1 %v546_v54 }
 0x178   :  { %934 = vmatmul.mubr.bf16.gmra.mrb[52].mxu1 %v545_v53 }
 0x1d3   :  { %v785_v2 = vpop.f32.mrb[64].mxu0 }
 0x1d4   :  { %v786_v57 = vadd.f32 %v785_v2, %v1562_v56  ;;  %v787_v58 = vpop.f32.mrb[65].mxu0 }
 0x1d5   :  { %v788_v59 = vadd.f32 %v787_v58, %v1566_v7  ;;  %v789_v60 = vpop.f32.mrb[66].mxu0 }
 0x1d6   :  { %944 = vst [vmem:[#allocation2] sm:$0xff] %v786_v57  ;;  %v790_v61 = vadd.f32 %v789_v60, %v1562_v56  ;;  %v791_v62 = vpop.f32.mrb[67].mxu0 }
 0x1d7   :  { %945 = vst [vmem:[#allocation2 + $0x8] sm:$0xff] %v788_v59  ;;  %v792_v63 = vadd.f32 %v791_v62, %v1566_v7 }
 0x1d8   :  { %946 = vst [vmem:[#allocation2 + $0x10] sm:$0xff] %v790_v61 }
 0x1d9   :  { %947 = vst [vmem:[#allocation2 + $0x18] sm:$0xff] %v792_v63 }
 0x1db   :  { %v795_v4 = vpop.f32.mrb[68].mxu0 }
 0x1dc   :  { %v796_v3 = vadd.f32 %v795_v4, %v1562_v56  ;;  %v797_v6 = vpop.f32.mrb[69].mxu0 }
 0x1dd   :  { %v798_v0 = vadd.f32 %v797_v6, %v1566_v7  ;;  %v799_v1 = vpop.f32.mrb[70].mxu0 }
 0x1de   :  { %948 = vst [vmem:[#allocation2 + $0x20] sm:$0xff] %v796_v3  ;;  %v800_v5 = vadd.f32 %v799_v1, %v1562_v56  ;;  %v801_v8 = vpop.f32.mrb[71].mxu0 }
 0x1df   :  { %949 = vst [vmem:[#allocation2 + $0x28] sm:$0xff] %v798_v0  ;;  %v802_v9 = vadd.f32 %v801_v8, %v1566_v7 }
 0x1e0   :  { %950 = vst [vmem:[#allocation2 + $0x30] sm:$0xff] %v800_v5 }
 0x1e1   :  { %951 = vst [vmem:[#allocation2 + $0x38] sm:$0xff] %v802_v9 }
 0x1e3   :  { %v805_v10 = vpop.f32.mrb[0].mxu1 }
 0x1e4   :  { %v806_v11 = vadd.f32 %v805_v10, %v1562_v56  ;;  %v807_v12 = vpop.f32.mrb[1].mxu1 }
 0x1e5   :  { %v808_v13 = vadd.f32 %v807_v12, %v1566_v7  ;;  %v809_v14 = vpop.f32.mrb[2].mxu1 }
 0x1e6   :  { %952 = vst [vmem:[#allocation2 + $0x40] sm:$0xff] %v806_v11  ;;  %v810_v15 = vadd.f32 %v809_v14, %v1562_v56  ;;  %v811_v16 = vpop.f32.mrb[3].mxu1 }
 0x1e7   :  { %953 = vst [vmem:[#allocation2 + $0x48] sm:$0xff] %v808_v13  ;;  %v812_v17 = vadd.f32 %v811_v16, %v1566_v7 }
 0x1e8   :  { %954 = vst [vmem:[#allocation2 + $0x50] sm:$0xff] %v810_v15 }
 0x1e9   :  { %955 = vst [vmem:[#allocation2 + $0x58] sm:$0xff] %v812_v17 }
 0x1eb   :  { %v815_v18 = vpop.f32.mrb[4].mxu1 }
 0x1ec   :  { %v816_v19 = vadd.f32 %v815_v18, %v1562_v56  ;;  %v817_v20 = vpop.f32.mrb[5].mxu1 }
 0x1ed   :  { %v818_v21 = vadd.f32 %v817_v20, %v1566_v7  ;;  %v819_v22 = vpop.f32.mrb[6].mxu1 }
 0x1ee   :  { %956 = vst [vmem:[#allocation2 + $0x60] sm:$0xff] %v816_v19  ;;  %v820_v23 = vadd.f32 %v819_v22, %v1562_v56  ;;  %v821_v24 = vpop.f32.mrb[7].mxu1 }
 0x1ef   :  { %957 = vst [vmem:[#allocation2 + $0x68] sm:$0xff] %v818_v21  ;;  %v822_v25 = vadd.f32 %v821_v24, %v1566_v7 }
 0x1f0   :  { %958 = vst [vmem:[#allocation2 + $0x70] sm:$0xff] %v820_v23 }
 0x1f1   :  { %959 = vst [vmem:[#allocation2 + $0x78] sm:$0xff] %v822_v25 }
 0x1f3   :  { %v825_v26 = vpop.f32.mrb[8].mxu1 }
 0x1f4   :  { %v826_v27 = vadd.f32 %v825_v26, %v1562_v56  ;;  %v827_v28 = vpop.f32.mrb[9].mxu1 }
 0x1f5   :  { %v828_v29 = vadd.f32 %v827_v28, %v1566_v7  ;;  %v829_v30 = vpop.f32.mrb[10].mxu1 }
 0x1f6   :  { %960 = vst [vmem:[#allocation2 + $0x80] sm:$0xff] %v826_v27  ;;  %v830_v31 = vadd.f32 %v829_v30, %v1562_v56  ;;  %v831_v32 = vpop.f32.mrb[11].mxu1 }
 0x1f7   :  { %961 = vst [vmem:[#allocation2 + $0x88] sm:$0xff] %v828_v29  ;;  %v832_v33 = vadd.f32 %v831_v32, %v1566_v7 }
 0x1f8   :  { %962 = vst [vmem:[#allocation2 + $0x90] sm:$0xff] %v830_v31 }
 0x1f9   :  { %963 = vst [vmem:[#allocation2 + $0x98] sm:$0xff] %v832_v33 }
 0x1fb   :  { %v835_v34 = vpop.f32.mrb[12].mxu1 }
 0x1fc   :  { %v836_v35 = vadd.f32 %v835_v34, %v1562_v56  ;;  %v837_v36 = vpop.f32.mrb[13].mxu1 }
 0x1fd   :  { %v838_v37 = vadd.f32 %v837_v36, %v1566_v7  ;;  %v839_v38 = vpop.f32.mrb[14].mxu1 }
 0x1fe   :  { %964 = vst [vmem:[#allocation2 + $0xa0] sm:$0xff] %v836_v35  ;;  %v840_v39 = vadd.f32 %v839_v38, %v1562_v56  ;;  %v841_v40 = vpop.f32.mrb[15].mxu1 }
 0x1ff   :  { %965 = vst [vmem:[#allocation2 + $0xa8] sm:$0xff] %v838_v37  ;;  %v842_v41 = vadd.f32 %v841_v40, %v1566_v7 }
 0x200   :  { %966 = vst [vmem:[#allocation2 + $0xb0] sm:$0xff] %v840_v39 }
 0x201   :  { %967 = vst [vmem:[#allocation2 + $0xb8] sm:$0xff] %v842_v41 }
 0x203   :  { %v845_v42 = vpop.f32.mrb[16].mxu1 }
 0x204   :  { %v846_v43 = vadd.f32 %v845_v42, %v1562_v56  ;;  %v847_v44 = vpop.f32.mrb[17].mxu1 }
 0x205   :  { %v848_v45 = vadd.f32 %v847_v44, %v1566_v7  ;;  %v849_v46 = vpop.f32.mrb[18].mxu1 }
 0x206   :  { %968 = vst [vmem:[#allocation2 + $0xc0] sm:$0xff] %v846_v43  ;;  %v850_v47 = vadd.f32 %v849_v46, %v1562_v56  ;;  %v851_v48 = vpop.f32.mrb[19].mxu1 }
 0x207   :  { %969 = vst [vmem:[#allocation2 + $0xc8] sm:$0xff] %v848_v45  ;;  %v852_v49 = vadd.f32 %v851_v48, %v1566_v7 }
 0x208   :  { %970 = vst [vmem:[#allocation2 + $0xd0] sm:$0xff] %v850_v47 }
 0x209   :  { %971 = vst [vmem:[#allocation2 + $0xd8] sm:$0xff] %v852_v49 }
 0x20b   :  { %v855_v50 = vpop.f32.mrb[20].mxu1 }
 0x20c   :  { %v856_v51 = vadd.f32 %v855_v50, %v1562_v56  ;;  %v857_v52 = vpop.f32.mrb[21].mxu1 }
 0x20d   :  { %v858_v53 = vadd.f32 %v857_v52, %v1566_v7  ;;  %v859_v54 = vpop.f32.mrb[22].mxu1 }
 0x20e   :  { %972 = vst [vmem:[#allocation2 + $0xe0] sm:$0xff] %v856_v51  ;;  %v860_v55 = vadd.f32 %v859_v54, %v1562_v56  ;;  %v861_v2 = vpop.f32.mrb[23].mxu1 }
 0x20f   :  { %973 = vst [vmem:[#allocation2 + $0xe8] sm:$0xff] %v858_v53  ;;  %v862_v57 = vadd.f32 %v861_v2, %v1566_v7 }
 0x210   :  { %974 = vst [vmem:[#allocation2 + $0xf0] sm:$0xff] %v860_v55 }
 0x211   :  { %975 = vst [vmem:[#allocation2 + $0xf8] sm:$0xff] %v862_v57 }
 0x213   :  { %v865_v58 = vpop.f32.mrb[24].mxu1 }
 0x214   :  { %v866_v59 = vadd.f32 %v865_v58, %v1562_v56  ;;  %v867_v60 = vpop.f32.mrb[25].mxu1 }
 0x215   :  { %v868_v61 = vadd.f32 %v867_v60, %v1566_v7  ;;  %v869_v62 = vpop.f32.mrb[26].mxu1 }
 0x216   :  { %976 = vst [vmem:[#allocation2 + $0x100] sm:$0xff] %v866_v59  ;;  %v870_v63 = vadd.f32 %v869_v62, %v1562_v56  ;;  %v871_v4 = vpop.f32.mrb[27].mxu1 }
 0x217   :  { %977 = vst [vmem:[#allocation2 + $0x108] sm:$0xff] %v868_v61  ;;  %v872_v3 = vadd.f32 %v871_v4, %v1566_v7 }
 0x218   :  { %978 = vst [vmem:[#allocation2 + $0x110] sm:$0xff] %v870_v63 }
 0x219   :  { %979 = vst [vmem:[#allocation2 + $0x118] sm:$0xff] %v872_v3 }
 0x21b   :  { %v875_v6 = vpop.f32.mrb[28].mxu1 }
 0x21c   :  { %v876_v0 = vadd.f32 %v875_v6, %v1562_v56  ;;  %v877_v1 = vpop.f32.mrb[29].mxu1 }
 0x21d   :  { %v878_v5 = vadd.f32 %v877_v1, %v1566_v7  ;;  %v879_v8 = vpop.f32.mrb[30].mxu1 }
 0x21e   :  { %980 = vst [vmem:[#allocation2 + $0x120] sm:$0xff] %v876_v0  ;;  %v880_v9 = vadd.f32 %v879_v8, %v1562_v56  ;;  %v881_v10 = vpop.f32.mrb[31].mxu1 }
 0x21f   :  { %981 = vst [vmem:[#allocation2 + $0x128] sm:$0xff] %v878_v5  ;;  %v882_v11 = vadd.f32 %v881_v10, %v1566_v7 }
 0x220   :  { %982 = vst [vmem:[#allocation2 + $0x130] sm:$0xff] %v880_v9 }
 0x221   :  { %983 = vst [vmem:[#allocation2 + $0x138] sm:$0xff] %v882_v11 }
 0x223   :  { %v885_v12 = vpop.f32.mrb[32].mxu1 }
 0x224   :  { %v886_v13 = vadd.f32 %v885_v12, %v1562_v56  ;;  %v887_v14 = vpop.f32.mrb[33].mxu1 }
 0x225   :  { %v888_v15 = vadd.f32 %v887_v14, %v1566_v7  ;;  %v889_v16 = vpop.f32.mrb[34].mxu1 }
 0x226   :  { %984 = vst [vmem:[#allocation2 + $0x140] sm:$0xff] %v886_v13  ;;  %v890_v17 = vadd.f32 %v889_v16, %v1562_v56  ;;  %v891_v18 = vpop.f32.mrb[35].mxu1 }
 0x227   :  { %985 = vst [vmem:[#allocation2 + $0x148] sm:$0xff] %v888_v15  ;;  %v892_v19 = vadd.f32 %v891_v18, %v1566_v7 }
 0x228   :  { %986 = vst [vmem:[#allocation2 + $0x150] sm:$0xff] %v890_v17 }
 0x229   :  { %987 = vst [vmem:[#allocation2 + $0x158] sm:$0xff] %v892_v19 }
 0x22b   :  { %v895_v20 = vpop.f32.mrb[36].mxu1 }
 0x22c   :  { %v896_v21 = vadd.f32 %v895_v20, %v1562_v56  ;;  %v897_v22 = vpop.f32.mrb[37].mxu1 }
 0x22d   :  { %v898_v23 = vadd.f32 %v897_v22, %v1566_v7  ;;  %v899_v24 = vpop.f32.mrb[38].mxu1 }
 0x22e   :  { %988 = vst [vmem:[#allocation2 + $0x160] sm:$0xff] %v896_v21  ;;  %v900_v25 = vadd.f32 %v899_v24, %v1562_v56  ;;  %v901_v26 = vpop.f32.mrb[39].mxu1 }
 0x22f   :  { %989 = vst [vmem:[#allocation2 + $0x168] sm:$0xff] %v898_v23  ;;  %v902_v27 = vadd.f32 %v901_v26, %v1566_v7 }
 0x230   :  { %990 = vst [vmem:[#allocation2 + $0x170] sm:$0xff] %v900_v25 }
 0x231   :  { %991 = vst [vmem:[#allocation2 + $0x178] sm:$0xff] %v902_v27 }
 0x233   :  { %v905_v28 = vpop.f32.mrb[40].mxu1 }
 0x234   :  { %v906_v29 = vadd.f32 %v905_v28, %v1562_v56  ;;  %v907_v30 = vpop.f32.mrb[41].mxu1 }
 0x235   :  { %v908_v31 = vadd.f32 %v907_v30, %v1566_v7  ;;  %v909_v32 = vpop.f32.mrb[42].mxu1 }
 0x236   :  { %992 = vst [vmem:[#allocation2 + $0x180] sm:$0xff] %v906_v29  ;;  %v910_v33 = vadd.f32 %v909_v32, %v1562_v56  ;;  %v911_v34 = vpop.f32.mrb[43].mxu1 }
 0x237   :  { %993 = vst [vmem:[#allocation2 + $0x188] sm:$0xff] %v908_v31  ;;  %v912_v35 = vadd.f32 %v911_v34, %v1566_v7 }
 0x238   :  { %994 = vst [vmem:[#allocation2 + $0x190] sm:$0xff] %v910_v33 }
 0x239   :  { %995 = vst [vmem:[#allocation2 + $0x198] sm:$0xff] %v912_v35 }
 0x23b   :  { %v915_v36 = vpop.f32.mrb[44].mxu1 }
 0x23c   :  { %v916_v37 = vadd.f32 %v915_v36, %v1562_v56  ;;  %v917_v38 = vpop.f32.mrb[45].mxu1 }
 0x23d   :  { %v918_v39 = vadd.f32 %v917_v38, %v1566_v7  ;;  %v919_v40 = vpop.f32.mrb[46].mxu1 }
 0x23e   :  { %996 = vst [vmem:[#allocation2 + $0x1a0] sm:$0xff] %v916_v37  ;;  %v920_v41 = vadd.f32 %v919_v40, %v1562_v56  ;;  %v921_v42 = vpop.f32.mrb[47].mxu1 }
 0x23f   :  { %997 = vst [vmem:[#allocation2 + $0x1a8] sm:$0xff] %v918_v39  ;;  %v922_v43 = vadd.f32 %v921_v42, %v1566_v7 }
 0x240   :  { %998 = vst [vmem:[#allocation2 + $0x1b0] sm:$0xff] %v920_v41 }
 0x241   :  { %999 = vst [vmem:[#allocation2 + $0x1b8] sm:$0xff] %v922_v43 }
 0x243   :  { %v925_v44 = vpop.f32.mrb[48].mxu1 }
 0x244   :  { %v926_v45 = vadd.f32 %v925_v44, %v1562_v56  ;;  %v927_v46 = vpop.f32.mrb[49].mxu1 }
 0x245   :  { %v928_v47 = vadd.f32 %v927_v46, %v1566_v7  ;;  %v929_v48 = vpop.f32.mrb[50].mxu1 }
 0x246   :  { %1000 = vst [vmem:[#allocation2 + $0x1c0] sm:$0xff] %v926_v45  ;;  %v930_v49 = vadd.f32 %v929_v48, %v1562_v56  ;;  %v931_v50 = vpop.f32.mrb[51].mxu1 }
 0x247   :  { %1001 = vst [vmem:[#allocation2 + $0x1c8] sm:$0xff] %v928_v47  ;;  %v932_v51 = vadd.f32 %v931_v50, %v1566_v7 }
 0x248   :  { %1002 = vst [vmem:[#allocation2 + $0x1d0] sm:$0xff] %v930_v49 }
 0x249   :  { %1003 = vst [vmem:[#allocation2 + $0x1d8] sm:$0xff] %v932_v51 }
 0x24b   :  { %v935_v52 = vpop.f32.mrb[52].mxu1 }
 0x24c   :  { %v936_v53 = vadd.f32 %v935_v52, %v1562_v56  ;;  %v937_v54 = vpop.f32.mrb[53].mxu1 }
 0x24d   :  { %v938_v55 = vadd.f32 %v937_v54, %v1566_v7  ;;  %v939_v2 = vpop.f32.mrb[54].mxu1 }
 0x24e   :  { %1004 = vst [vmem:[#allocation2 + $0x1e0] sm:$0xff] %v936_v53  ;;  %v940_v57 = vadd.f32 %v939_v2, %v1562_v56  ;;  %v941_v58 = vpop.f32.mrb[55].mxu1 }
 0x24f   :  { %1005 = vst [vmem:[#allocation2 + $0x1e8] sm:$0xff] %v938_v55  ;;  %v942_v59 = vadd.f32 %v941_v58, %v1566_v7 }
 0x250   :  { %1006 = vst [vmem:[#allocation2 + $0x1f0] sm:$0xff] %v940_v57 }
 0x251   :  { %1007 = vst [vmem:[#allocation2 + $0x1f8] sm:$0xff] %v942_v59 }
 0x252   :  { %1223 = shalt.err (!%p1220_p4)
}
 0x253   :  { %s1224_s22 = scalar_lea.hbm %s1649_s5, 8192 }
 0x254   :  { %p1225_p5 = scmp.ne.s32.totalorder %s1649_s5, %s1224_s22  ;;  %p1228_p6 = scmp.lt.u32.totalorder %s1224_s22, %s1649_s5 }
 0x256   :  { %p1230_p7 = pnand %p1228_p6, %p1225_p5 }
 0x258   :  { %1233 = shalt.err (!%p1230_p7)
}
 0x259   :  { %s1238_s27 = smov 256   ;;  %s1239_s28 = smov 16  }
 0x25a   :  { %1019 = dma.vmem_to_hbm [thread:$0]  %s1014_s18, 8192, %s1649_s5, [#allocation3], %s1238_s27, %s1238_s27, %s1239_s28  }
 0x25b   :  { %1234 = dma.done.wait [#allocation3], 8192  }
 0x25c   :  { %1235 = vsyncadd [#allocation3], 4294959104 }
 0x25d   :  { %1023 = vsyncpa [#allocation3], 1 }

</bundles_post_ra>
